<compile_context>
chip_gen: v5e
topology: v5e:2x2
jax: 0.10.0
libtpu: 0.0.40
codegen_flags: <defaults>
</compile_context>

<pallas_src>
import functools
import math

import jax
import jax.numpy as jnp
from jax import lax
from jax.experimental import pallas as pl
from jax.experimental.pallas import tpu as pltpu

_LANES = 128
_EPS = 1e-12


def _round_up(x, n):
    return ((x + n - 1) // n) * n


def _disentangle_kernel(*refs, num_modalities, inv_bd, inv_b,
                        lambda_consistency, lambda_orthogonal):
    M = num_modalities
    s_refs = refs[:M]                 # M x (B, T, 128) tiles (native dtype)
    p_refs = refs[M:2 * M]
    out_ref = refs[2 * M]             # (1, 1) f32
    ss_acc, pp_acc, sp_acc, csq_acc = refs[2 * M + 1:]

    k = pl.program_id(0)

    @pl.when(k == 0)
    def _init():
        ss_acc[...] = jnp.zeros_like(ss_acc)
        pp_acc[...] = jnp.zeros_like(pp_acc)
        sp_acc[...] = jnp.zeros_like(sp_acc)
        csq_acc[...] = jnp.zeros_like(csq_acc)

    # --- streaming accumulation for this D-tile -------------------------
    ssum = None
    for m in range(M):
        s = s_refs[m][...].astype(jnp.float32)      # (B, T, 128)
        p = p_refs[m][...].astype(jnp.float32)      # (B, T, 128)
        ss_acc[m] += jnp.sum(s * s, axis=1)         # (B, 128) lane-dense
        pp_acc[m] += jnp.sum(p * p, axis=1)
        sp_acc[m] += jnp.sum(s * p, axis=1)
        ssum = s if ssum is None else ssum + s      # Σ_m s_m (elementwise)
    csq_acc[...] += jnp.sum(ssum * ssum, axis=1)    # (B, 128)

    # --- finalize on the last tile ---------------------------------------
    @pl.when(k == pl.num_programs(0) - 1)
    def _finalize():
        ss = jnp.sum(ss_acc[...], axis=2)           # (M, B)
        pp = jnp.sum(pp_acc[...], axis=2)
        sp = jnp.sum(sp_acc[...], axis=2)

        # cos(s, p) with F.normalize eps semantics: x / max(||x||, 1e-12)
        inv_s = lax.rsqrt(jnp.maximum(ss, _EPS * _EPS))
        inv_p = lax.rsqrt(jnp.maximum(pp, _EPS * _EPS))
        cos = sp * inv_s * inv_p                    # (M, B)
        cos2 = cos * cos
        loss_o = jnp.sum(jnp.sum(cos2, axis=1, keepdims=True),
                         axis=0, keepdims=True) * inv_b          # (1, 1)

        # Σ_{i<j} ||s_i - s_j||² = M·Σ_i||s_i||² − ||Σ_i s_i||²
        total_sq = jnp.sum(jnp.sum(ss, axis=1, keepdims=True),
                           axis=0, keepdims=True)                 # (1, 1)
        cross_sq = jnp.sum(jnp.sum(csq_acc[...], axis=1, keepdims=True),
                           axis=0, keepdims=True)                 # (1, 1)
        loss_c = (float(M) * total_sq - cross_sq) * inv_bd        # (1, 1)

        out_ref[...] = (lambda_consistency * loss_c
                        + lambda_orthogonal * loss_o)


def cross_modal_disentangle_loss(shared_feats, private_feats,
                                 lambda_consistency=1.0,
                                 lambda_orthogonal=0.1,
                                 vmem_budget_bytes=24 * 1024 * 1024):
    """shared_feats / private_feats: dict[str, (B, C, H, W)] arrays (any float dtype)."""
    modals = list(shared_feats.keys())
    M = len(modals)
    x0 = shared_feats[modals[0]]
    B = x0.shape[0]
    D = int(math.prod(x0.shape[1:]))
    itemsize = jnp.dtype(x0.dtype).itemsize

    # Lay the flattened D axis out as (rows-of-128) x 128 lanes.
    R = pl.cdiv(D, _LANES)
    # Pick a D-tile so that 2M inputs x 2 pipeline buffers fit the VMEM budget.
    bytes_per_row = 2 * (2 * M) * B * _LANES * itemsize
    tile_rows = max(8, (vmem_budget_bytes // max(bytes_per_row, 1)) // 8 * 8)
    tile_rows = min(tile_rows, 1024, _round_up(R, 8))
    R_pad = _round_up(R, tile_rows)
    D_pad = R_pad * _LANES
    grid = (R_pad // tile_rows,)

    def _prep(x):
        flat = x.reshape(B, -1)                     # == torch .view(B, -1); no cast
        if D_pad != D:                              # zero-pad only if needed (exact)
            flat = jnp.pad(flat, ((0, 0), (0, D_pad - D)))
        return flat.reshape(B, R_pad, _LANES)

    inputs = ([_prep(shared_feats[m]) for m in modals]
              + [_prep(private_feats[m]) for m in modals])

    kernel = functools.partial(
        _disentangle_kernel,
        num_modalities=M,
        inv_bd=1.0 / float(B * D),
        inv_b=1.0 / float(B),
        lambda_consistency=float(lambda_consistency),
        lambda_orthogonal=float(lambda_orthogonal),
    )

    feat_spec = pl.BlockSpec((B, tile_rows, _LANES), lambda k: (0, k, 0))
    cost = pl.CostEstimate(
        flops=10 * M * B * D_pad,
        transcendentals=2 * M * B,
        bytes_accessed=2 * M * B * D_pad * itemsize + 4,
    )

    out = pl.pallas_call(
        kernel,
        out_shape=jax.ShapeDtypeStruct((1, 1), jnp.float32),
        grid=grid,
        in_specs=[feat_spec] * (2 * M),
        out_specs=pl.BlockSpec((1, 1), lambda k: (0, 0)),
        scratch_shapes=[
            pltpu.VMEM((M, B, _LANES), jnp.float32),   # ss accumulator
            pltpu.VMEM((M, B, _LANES), jnp.float32),   # pp accumulator
            pltpu.VMEM((M, B, _LANES), jnp.float32),   # sp accumulator
            pltpu.VMEM((B, _LANES), jnp.float32),      # (Σ_m s)² accumulator
        ],
        compiler_params=pltpu.CompilerParams(
            dimension_semantics=("arbitrary",),
            vmem_limit_bytes=48 * 1024 * 1024,
        ),
        cost_estimate=cost,
    )(*inputs)
    return out[0, 0]


def _reference_loss(shared_feats, private_feats,
                    lambda_consistency=1.0, lambda_orthogonal=0.1):
    # Pure-JAX reference mirroring the PyTorch module.
    modals = list(shared_feats.keys())
    loss_c = 0.0
    for i in range(len(modals)):
        for j in range(i + 1, len(modals)):
            loss_c += jnp.mean(
                (shared_feats[modals[i]].astype(jnp.float32)
                 - shared_feats[modals[j]].astype(jnp.float32)) ** 2)
    loss_o = 0.0
    for m in modals:
        s = shared_feats[m].astype(jnp.float32)
        p = private_feats[m].astype(jnp.float32)
        B = s.shape[0]
        s_flat = s.reshape(B, -1)
        p_flat = p.reshape(B, -1)
        s_n = s_flat / jnp.maximum(
            jnp.linalg.norm(s_flat, axis=1, keepdims=True), 1e-12)
        p_n = p_flat / jnp.maximum(
            jnp.linalg.norm(p_flat, axis=1, keepdims=True), 1e-12)
        loss_o += jnp.mean(jnp.sum(s_n * p_n, axis=1) ** 2)
    return lambda_consistency * loss_c + lambda_orthogonal * loss_o


def _make_inputs(key, modals, shape, dtype=jnp.float32):
    shared, private = {}, {}
    for m in modals:
        key, k1, k2 = jax.random.split(key, 3)
        shared[m] = jax.random.normal(k1, shape, dtype=dtype)
        private[m] = jax.random.normal(k2, shape, dtype=dtype)
    return key, shared, private


if __name__ == "__main__":
    key = jax.random.PRNGKey(0)
    modals = ["rgb", "depth", "event"]

    # Case 1: D = 4*16*16 = 1024 (lane-aligned, single tile).
    key, shared, private = _make_inputs(key, modals, (2, 4, 16, 16))
    loss = cross_modal_disentangle_loss(shared, private, 1.0, 0.1)
    loss = jax.block_until_ready(loss)
    ref = _reference_loss(shared, private, 1.0, 0.1)
    assert jnp.allclose(loss, ref, rtol=1e-5, atol=1e-5), (loss, ref)

    # Case 2: D = 3*15*15 = 675 (non-aligned -> exercises zero-padding path).
    key, shared2, private2 = _make_inputs(key, modals, (2, 3, 15, 15))
    loss2 = cross_modal_disentangle_loss(shared2, private2, 1.0, 0.1)
    loss2 = jax.block_until_ready(loss2)
    ref2 = _reference_loss(shared2, private2, 1.0, 0.1)
    assert jnp.allclose(loss2, ref2, rtol=1e-5, atol=1e-5), (loss2, ref2)

    print("KERNEL_OK")
</pallas_src>

<mosaic_0001>
module attributes {stable_mosaic.version = 11 : i64} {
  func.func @_disentangle_kernel(%arg0: i32, %arg1: memref<2x8x128xf32, #tpu.memory_space<vmem>>, %arg2: memref<2x8x128xf32, #tpu.memory_space<vmem>>, %arg3: memref<2x8x128xf32, #tpu.memory_space<vmem>>, %arg4: memref<2x8x128xf32, #tpu.memory_space<vmem>>, %arg5: memref<2x8x128xf32, #tpu.memory_space<vmem>>, %arg6: memref<2x8x128xf32, #tpu.memory_space<vmem>>, %arg7: memref<1x1xf32, #tpu.memory_space<vmem>>, %arg8: memref<3x2x128xf32, #tpu.memory_space<vmem>>, %arg9: memref<3x2x128xf32, #tpu.memory_space<vmem>>, %arg10: memref<3x2x128xf32, #tpu.memory_space<vmem>>, %arg11: memref<2x128xf32, #tpu.memory_space<vmem>>) attributes {dimension_semantics = [#tpu.dimension_semantics<arbitrary>], iteration_bounds = array<i64: 1>, scalar_prefetch = 0 : i64, scratch_operands = 4 : i64, tpu.core_type = #tpu.core_type<tc>, window_params = [{transform_indices = @transform_0, window_bounds = array<i64: 2, 8, 128>}, {transform_indices = @transform_1, window_bounds = array<i64: 2, 8, 128>}, {transform_indices = @transform_2, window_bounds = array<i64: 2, 8, 128>}, {transform_indices = @transform_3, window_bounds = array<i64: 2, 8, 128>}, {transform_indices = @transform_4, window_bounds = array<i64: 2, 8, 128>}, {transform_indices = @transform_5, window_bounds = array<i64: 2, 8, 128>}, {pipeline_mode = #tpu.pipeline_mode<synchronous>, transform_indices = @transform_6, window_bounds = array<i64: 1, 1>}]} {
    %c0_i32 = arith.constant 0 : i32
    %0 = arith.cmpi eq, %arg0, %c0_i32 : i32
    %1 = arith.extui %0 : i1 to i32
    %c0_i32_0 = arith.constant 0 : i32
    %2 = arith.cmpi ne, %1, %c0_i32_0 : i32
    scf.if %2 {
      %cst_85 = arith.constant 0.000000e+00 : f32
      %91 = vector.broadcast %cst_85 : f32 to vector<3x2x128xf32>
      %c0_86 = arith.constant 0 : index
      %c0_87 = arith.constant 0 : index
      %c0_88 = arith.constant 0 : index
      %92 = vector.load %arg8[%c0_86, %c0_87, %c0_88] : memref<3x2x128xf32, #tpu.memory_space<vmem>>, vector<3x2x128xf32>
      tpu.vector_store %arg8[%c0_86, %c0_87, %c0_88], %91 {strides = array<i32>} : memref<3x2x128xf32, #tpu.memory_space<vmem>>, vector<3x2x128xf32>,
      %cst_89 = arith.constant 0.000000e+00 : f32
      %93 = vector.broadcast %cst_89 : f32 to vector<3x2x128xf32>
      %c0_90 = arith.constant 0 : index
      %c0_91 = arith.constant 0 : index
      %c0_92 = arith.constant 0 : index
      %94 = vector.load %arg9[%c0_90, %c0_91, %c0_92] : memref<3x2x128xf32, #tpu.memory_space<vmem>>, vector<3x2x128xf32>
      tpu.vector_store %arg9[%c0_90, %c0_91, %c0_92], %93 {strides = array<i32>} : memref<3x2x128xf32, #tpu.memory_space<vmem>>, vector<3x2x128xf32>,
      %cst_93 = arith.constant 0.000000e+00 : f32
      %95 = vector.broadcast %cst_93 : f32 to vector<3x2x128xf32>
      %c0_94 = arith.constant 0 : index
      %c0_95 = arith.constant 0 : index
      %c0_96 = arith.constant 0 : index
      %96 = vector.load %arg10[%c0_94, %c0_95, %c0_96] : memref<3x2x128xf32, #tpu.memory_space<vmem>>, vector<3x2x128xf32>
      tpu.vector_store %arg10[%c0_94, %c0_95, %c0_96], %95 {strides = array<i32>} : memref<3x2x128xf32, #tpu.memory_space<vmem>>, vector<3x2x128xf32>,
      %cst_97 = arith.constant 0.000000e+00 : f32
      %97 = vector.broadcast %cst_97 : f32 to vector<2x128xf32>
      %c0_98 = arith.constant 0 : index
      %c0_99 = arith.constant 0 : index
      %98 = vector.load %arg11[%c0_98, %c0_99] : memref<2x128xf32, #tpu.memory_space<vmem>>, vector<2x128xf32>
      tpu.vector_store %arg11[%c0_98, %c0_99], %97 {strides = array<i32>} : memref<2x128xf32, #tpu.memory_space<vmem>>, vector<2x128xf32>,
    } else {
    }
    %c0 = arith.constant 0 : index
    %c0_1 = arith.constant 0 : index
    %c0_2 = arith.constant 0 : index
    %3 = vector.load %arg1[%c0, %c0_1, %c0_2] : memref<2x8x128xf32, #tpu.memory_space<vmem>>, vector<2x8x128xf32>
    %c0_3 = arith.constant 0 : index
    %c0_4 = arith.constant 0 : index
    %c0_5 = arith.constant 0 : index
    %4 = vector.load %arg4[%c0_3, %c0_4, %c0_5] : memref<2x8x128xf32, #tpu.memory_space<vmem>>, vector<2x8x128xf32>
    %c0_6 = arith.constant 0 : index
    %c0_7 = arith.constant 0 : index
    %c0_8 = arith.constant 0 : index
    %5 = vector.load %arg8[%c0_6, %c0_7, %c0_8] : memref<3x2x128xf32, #tpu.memory_space<vmem>>, vector<1x2x128xf32>
    %6 = vector.shape_cast %5 : vector<1x2x128xf32> to vector<2x128xf32>
    %7 = arith.mulf %3, %3 : vector<2x8x128xf32>
    %cst = arith.constant dense<0.000000e+00> : vector<2x128xf32>
    %8 = vector.multi_reduction <add>, %7, %cst [1] : vector<2x8x128xf32> to vector<2x128xf32>
    %9 = arith.addf %6, %8 : vector<2x128xf32>
    %c0_9 = arith.constant 0 : index
    %c0_10 = arith.constant 0 : index
    %c0_11 = arith.constant 0 : index
    %10 = vector.load %arg8[%c0_9, %c0_10, %c0_11] : memref<3x2x128xf32, #tpu.memory_space<vmem>>, vector<1x2x128xf32>
    %11 = vector.shape_cast %10 : vector<1x2x128xf32> to vector<2x128xf32>
    %12 = vector.shape_cast %9 : vector<2x128xf32> to vector<1x2x128xf32>
    tpu.vector_store %arg8[%c0_9, %c0_10, %c0_11], %12 {strides = array<i32>} : memref<3x2x128xf32, #tpu.memory_space<vmem>>, vector<1x2x128xf32>,
    %c0_12 = arith.constant 0 : index
    %c0_13 = arith.constant 0 : index
    %c0_14 = arith.constant 0 : index
    %13 = vector.load %arg9[%c0_12, %c0_13, %c0_14] : memref<3x2x128xf32, #tpu.memory_space<vmem>>, vector<1x2x128xf32>
    %14 = vector.shape_cast %13 : vector<1x2x128xf32> to vector<2x128xf32>
    %15 = arith.mulf %4, %4 : vector<2x8x128xf32>
    %cst_15 = arith.constant dense<0.000000e+00> : vector<2x128xf32>
    %16 = vector.multi_reduction <add>, %15, %cst_15 [1] : vector<2x8x128xf32> to vector<2x128xf32>
    %17 = arith.addf %14, %16 : vector<2x128xf32>
    %c0_16 = arith.constant 0 : index
    %c0_17 = arith.constant 0 : index
    %c0_18 = arith.constant 0 : index
    %18 = vector.load %arg9[%c0_16, %c0_17, %c0_18] : memref<3x2x128xf32, #tpu.memory_space<vmem>>, vector<1x2x128xf32>
    %19 = vector.shape_cast %18 : vector<1x2x128xf32> to vector<2x128xf32>
    %20 = vector.shape_cast %17 : vector<2x128xf32> to vector<1x2x128xf32>
    tpu.vector_store %arg9[%c0_16, %c0_17, %c0_18], %20 {strides = array<i32>} : memref<3x2x128xf32, #tpu.memory_space<vmem>>, vector<1x2x128xf32>,
    %c0_19 = arith.constant 0 : index
    %c0_20 = arith.constant 0 : index
    %c0_21 = arith.constant 0 : index
    %21 = vector.load %arg10[%c0_19, %c0_20, %c0_21] : memref<3x2x128xf32, #tpu.memory_space<vmem>>, vector<1x2x128xf32>
    %22 = vector.shape_cast %21 : vector<1x2x128xf32> to vector<2x128xf32>
    %23 = arith.mulf %3, %4 : vector<2x8x128xf32>
    %cst_22 = arith.constant dense<0.000000e+00> : vector<2x128xf32>
    %24 = vector.multi_reduction <add>, %23, %cst_22 [1] : vector<2x8x128xf32> to vector<2x128xf32>
    %25 = arith.addf %22, %24 : vector<2x128xf32>
    %c0_23 = arith.constant 0 : index
    %c0_24 = arith.constant 0 : index
    %c0_25 = arith.constant 0 : index
    %26 = vector.load %arg10[%c0_23, %c0_24, %c0_25] : memref<3x2x128xf32, #tpu.memory_space<vmem>>, vector<1x2x128xf32>
    %27 = vector.shape_cast %26 : vector<1x2x128xf32> to vector<2x128xf32>
    %28 = vector.shape_cast %25 : vector<2x128xf32> to vector<1x2x128xf32>
    tpu.vector_store %arg10[%c0_23, %c0_24, %c0_25], %28 {strides = array<i32>} : memref<3x2x128xf32, #tpu.memory_space<vmem>>, vector<1x2x128xf32>,
    %c0_26 = arith.constant 0 : index
    %c0_27 = arith.constant 0 : index
    %c0_28 = arith.constant 0 : index
    %29 = vector.load %arg2[%c0_26, %c0_27, %c0_28] : memref<2x8x128xf32, #tpu.memory_space<vmem>>, vector<2x8x128xf32>
    %c0_29 = arith.constant 0 : index
    %c0_30 = arith.constant 0 : index
    %c0_31 = arith.constant 0 : index
    %30 = vector.load %arg5[%c0_29, %c0_30, %c0_31] : memref<2x8x128xf32, #tpu.memory_space<vmem>>, vector<2x8x128xf32>
    %c1 = arith.constant 1 : index
    %c0_32 = arith.constant 0 : index
    %c0_33 = arith.constant 0 : index
    %31 = vector.load %arg8[%c1, %c0_32, %c0_33] : memref<3x2x128xf32, #tpu.memory_space<vmem>>, vector<1x2x128xf32>
    %32 = vector.shape_cast %31 : vector<1x2x128xf32> to vector<2x128xf32>
    %33 = arith.mulf %29, %29 : vector<2x8x128xf32>
    %cst_34 = arith.constant dense<0.000000e+00> : vector<2x128xf32>
    %34 = vector.multi_reduction <add>, %33, %cst_34 [1] : vector<2x8x128xf32> to vector<2x128xf32>
    %35 = arith.addf %32, %34 : vector<2x128xf32>
    %c1_35 = arith.constant 1 : index
    %c0_36 = arith.constant 0 : index
    %c0_37 = arith.constant 0 : index
    %36 = vector.load %arg8[%c1_35, %c0_36, %c0_37] : memref<3x2x128xf32, #tpu.memory_space<vmem>>, vector<1x2x128xf32>
    %37 = vector.shape_cast %36 : vector<1x2x128xf32> to vector<2x128xf32>
    %38 = vector.shape_cast %35 : vector<2x128xf32> to vector<1x2x128xf32>
    tpu.vector_store %arg8[%c1_35, %c0_36, %c0_37], %38 {strides = array<i32>} : memref<3x2x128xf32, #tpu.memory_space<vmem>>, vector<1x2x128xf32>,
    %c1_38 = arith.constant 1 : index
    %c0_39 = arith.constant 0 : index
    %c0_40 = arith.constant 0 : index
    %39 = vector.load %arg9[%c1_38, %c0_39, %c0_40] : memref<3x2x128xf32, #tpu.memory_space<vmem>>, vector<1x2x128xf32>
    %40 = vector.shape_cast %39 : vector<1x2x128xf32> to vector<2x128xf32>
    %41 = arith.mulf %30, %30 : vector<2x8x128xf32>
    %cst_41 = arith.constant dense<0.000000e+00> : vector<2x128xf32>
    %42 = vector.multi_reduction <add>, %41, %cst_41 [1] : vector<2x8x128xf32> to vector<2x128xf32>
    %43 = arith.addf %40, %42 : vector<2x128xf32>
    %c1_42 = arith.constant 1 : index
    %c0_43 = arith.constant 0 : index
    %c0_44 = arith.constant 0 : index
    %44 = vector.load %arg9[%c1_42, %c0_43, %c0_44] : memref<3x2x128xf32, #tpu.memory_space<vmem>>, vector<1x2x128xf32>
    %45 = vector.shape_cast %44 : vector<1x2x128xf32> to vector<2x128xf32>
    %46 = vector.shape_cast %43 : vector<2x128xf32> to vector<1x2x128xf32>
    tpu.vector_store %arg9[%c1_42, %c0_43, %c0_44], %46 {strides = array<i32>} : memref<3x2x128xf32, #tpu.memory_space<vmem>>, vector<1x2x128xf32>,
    %c1_45 = arith.constant 1 : index
    %c0_46 = arith.constant 0 : index
    %c0_47 = arith.constant 0 : index
    %47 = vector.load %arg10[%c1_45, %c0_46, %c0_47] : memref<3x2x128xf32, #tpu.memory_space<vmem>>, vector<1x2x128xf32>
    %48 = vector.shape_cast %47 : vector<1x2x128xf32> to vector<2x128xf32>
    %49 = arith.mulf %29, %30 : vector<2x8x128xf32>
    %cst_48 = arith.constant dense<0.000000e+00> : vector<2x128xf32>
    %50 = vector.multi_reduction <add>, %49, %cst_48 [1] : vector<2x8x128xf32> to vector<2x128xf32>
    %51 = arith.addf %48, %50 : vector<2x128xf32>
    %c1_49 = arith.constant 1 : index
    %c0_50 = arith.constant 0 : index
    %c0_51 = arith.constant 0 : index
    %52 = vector.load %arg10[%c1_49, %c0_50, %c0_51] : memref<3x2x128xf32, #tpu.memory_space<vmem>>, vector<1x2x128xf32>
    %53 = vector.shape_cast %52 : vector<1x2x128xf32> to vector<2x128xf32>
    %54 = vector.shape_cast %51 : vector<2x128xf32> to vector<1x2x128xf32>
    tpu.vector_store %arg10[%c1_49, %c0_50, %c0_51], %54 {strides = array<i32>} : memref<3x2x128xf32, #tpu.memory_space<vmem>>, vector<1x2x128xf32>,
    %55 = arith.addf %3, %29 : vector<2x8x128xf32>
    %c0_52 = arith.constant 0 : index
    %c0_53 = arith.constant 0 : index
    %c0_54 = arith.constant 0 : index
    %56 = vector.load %arg3[%c0_52, %c0_53, %c0_54] : memref<2x8x128xf32, #tpu.memory_space<vmem>>, vector<2x8x128xf32>
    %c0_55 = arith.constant 0 : index
    %c0_56 = arith.constant 0 : index
    %c0_57 = arith.constant 0 : index
    %57 = vector.load %arg6[%c0_55, %c0_56, %c0_57] : memref<2x8x128xf32, #tpu.memory_space<vmem>>, vector<2x8x128xf32>
    %c2 = arith.constant 2 : index
    %c0_58 = arith.constant 0 : index
    %c0_59 = arith.constant 0 : index
    %58 = vector.load %arg8[%c2, %c0_58, %c0_59] : memref<3x2x128xf32, #tpu.memory_space<vmem>>, vector<1x2x128xf32>
    %59 = vector.shape_cast %58 : vector<1x2x128xf32> to vector<2x128xf32>
    %60 = arith.mulf %56, %56 : vector<2x8x128xf32>
    %cst_60 = arith.constant dense<0.000000e+00> : vector<2x128xf32>
    %61 = vector.multi_reduction <add>, %60, %cst_60 [1] : vector<2x8x128xf32> to vector<2x128xf32>
    %62 = arith.addf %59, %61 : vector<2x128xf32>
    %c2_61 = arith.constant 2 : index
    %c0_62 = arith.constant 0 : index
    %c0_63 = arith.constant 0 : index
    %63 = vector.load %arg8[%c2_61, %c0_62, %c0_63] : memref<3x2x128xf32, #tpu.memory_space<vmem>>, vector<1x2x128xf32>
    %64 = vector.shape_cast %63 : vector<1x2x128xf32> to vector<2x128xf32>
    %65 = vector.shape_cast %62 : vector<2x128xf32> to vector<1x2x128xf32>
    tpu.vector_store %arg8[%c2_61, %c0_62, %c0_63], %65 {strides = array<i32>} : memref<3x2x128xf32, #tpu.memory_space<vmem>>, vector<1x2x128xf32>,
    %c2_64 = arith.constant 2 : index
    %c0_65 = arith.constant 0 : index
    %c0_66 = arith.constant 0 : index
    %66 = vector.load %arg9[%c2_64, %c0_65, %c0_66] : memref<3x2x128xf32, #tpu.memory_space<vmem>>, vector<1x2x128xf32>
    %67 = vector.shape_cast %66 : vector<1x2x128xf32> to vector<2x128xf32>
    %68 = arith.mulf %57, %57 : vector<2x8x128xf32>
    %cst_67 = arith.constant dense<0.000000e+00> : vector<2x128xf32>
    %69 = vector.multi_reduction <add>, %68, %cst_67 [1] : vector<2x8x128xf32> to vector<2x128xf32>
    %70 = arith.addf %67, %69 : vector<2x128xf32>
    %c2_68 = arith.constant 2 : index
    %c0_69 = arith.constant 0 : index
    %c0_70 = arith.constant 0 : index
    %71 = vector.load %arg9[%c2_68, %c0_69, %c0_70] : memref<3x2x128xf32, #tpu.memory_space<vmem>>, vector<1x2x128xf32>
    %72 = vector.shape_cast %71 : vector<1x2x128xf32> to vector<2x128xf32>
    %73 = vector.shape_cast %70 : vector<2x128xf32> to vector<1x2x128xf32>
    tpu.vector_store %arg9[%c2_68, %c0_69, %c0_70], %73 {strides = array<i32>} : memref<3x2x128xf32, #tpu.memory_space<vmem>>, vector<1x2x128xf32>,
    %c2_71 = arith.constant 2 : index
    %c0_72 = arith.constant 0 : index
    %c0_73 = arith.constant 0 : index
    %74 = vector.load %arg10[%c2_71, %c0_72, %c0_73] : memref<3x2x128xf32, #tpu.memory_space<vmem>>, vector<1x2x128xf32>
    %75 = vector.shape_cast %74 : vector<1x2x128xf32> to vector<2x128xf32>
    %76 = arith.mulf %56, %57 : vector<2x8x128xf32>
    %cst_74 = arith.constant dense<0.000000e+00> : vector<2x128xf32>
    %77 = vector.multi_reduction <add>, %76, %cst_74 [1] : vector<2x8x128xf32> to vector<2x128xf32>
    %78 = arith.addf %75, %77 : vector<2x128xf32>
    %c2_75 = arith.constant 2 : index
    %c0_76 = arith.constant 0 : index
    %c0_77 = arith.constant 0 : index
    %79 = vector.load %arg10[%c2_75, %c0_76, %c0_77] : memref<3x2x128xf32, #tpu.memory_space<vmem>>, vector<1x2x128xf32>
    %80 = vector.shape_cast %79 : vector<1x2x128xf32> to vector<2x128xf32>
    %81 = vector.shape_cast %78 : vector<2x128xf32> to vector<1x2x128xf32>
    tpu.vector_store %arg10[%c2_75, %c0_76, %c0_77], %81 {strides = array<i32>} : memref<3x2x128xf32, #tpu.memory_space<vmem>>, vector<1x2x128xf32>,
    %82 = arith.addf %55, %56 : vector<2x8x128xf32>
    %c0_78 = arith.constant 0 : index
    %c0_79 = arith.constant 0 : index
    %83 = vector.load %arg11[%c0_78, %c0_79] : memref<2x128xf32, #tpu.memory_space<vmem>>, vector<2x128xf32>
    %84 = arith.mulf %82, %82 : vector<2x8x128xf32>
    %cst_80 = arith.constant dense<0.000000e+00> : vector<2x128xf32>
    %85 = vector.multi_reduction <add>, %84, %cst_80 [1] : vector<2x8x128xf32> to vector<2x128xf32>
    %86 = arith.addf %83, %85 : vector<2x128xf32>
    %c0_81 = arith.constant 0 : index
    %c0_82 = arith.constant 0 : index
    %87 = vector.load %arg11[%c0_81, %c0_82] : memref<2x128xf32, #tpu.memory_space<vmem>>, vector<2x128xf32>
    tpu.vector_store %arg11[%c0_81, %c0_82], %86 {strides = array<i32>} : memref<2x128xf32, #tpu.memory_space<vmem>>, vector<2x128xf32>,
    %c0_i32_83 = arith.constant 0 : i32
    %88 = arith.cmpi eq, %arg0, %c0_i32_83 : i32
    %89 = arith.extui %88 : i1 to i32
    %c0_i32_84 = arith.constant 0 : i32
    %90 = arith.cmpi ne, %89, %c0_i32_84 : i32
    scf.if %90 {
      %c0_85 = arith.constant 0 : index
      %c0_86 = arith.constant 0 : index
      %c0_87 = arith.constant 0 : index
      %91 = vector.load %arg8[%c0_85, %c0_86, %c0_87] : memref<3x2x128xf32, #tpu.memory_space<vmem>>, vector<3x2x128xf32>
      %cst_88 = arith.constant dense<0.000000e+00> : vector<3x2xf32>
      %92 = vector.multi_reduction <add>, %91, %cst_88 [2] : vector<3x2x128xf32> to vector<3x2xf32>
      %c0_89 = arith.constant 0 : index
      %c0_90 = arith.constant 0 : index
      %c0_91 = arith.constant 0 : index
      %93 = vector.load %arg9[%c0_89, %c0_90, %c0_91] : memref<3x2x128xf32, #tpu.memory_space<vmem>>, vector<3x2x128xf32>
      %cst_92 = arith.constant dense<0.000000e+00> : vector<3x2xf32>
      %94 = vector.multi_reduction <add>, %93, %cst_92 [2] : vector<3x2x128xf32> to vector<3x2xf32>
      %c0_93 = arith.constant 0 : index
      %c0_94 = arith.constant 0 : index
      %c0_95 = arith.constant 0 : index
      %95 = vector.load %arg10[%c0_93, %c0_94, %c0_95] : memref<3x2x128xf32, #tpu.memory_space<vmem>>, vector<3x2x128xf32>
      %cst_96 = arith.constant dense<0.000000e+00> : vector<3x2xf32>
      %96 = vector.multi_reduction <add>, %95, %cst_96 [2] : vector<3x2x128xf32> to vector<3x2xf32>
      %cst_97 = arith.constant 1.000000e-24 : f32
      %97 = vector.broadcast %cst_97 : f32 to vector<3x2xf32>
      %98 = arith.maximumf %92, %97 : vector<3x2xf32>
      %99 = math.rsqrt %98 : vector<3x2xf32>
      %cst_98 = arith.constant 1.000000e-24 : f32
      %100 = vector.broadcast %cst_98 : f32 to vector<3x2xf32>
      %101 = arith.maximumf %94, %100 : vector<3x2xf32>
      %102 = math.rsqrt %101 : vector<3x2xf32>
      %103 = arith.mulf %96, %99 : vector<3x2xf32>
      %104 = arith.mulf %103, %102 : vector<3x2xf32>
      %105 = arith.mulf %104, %104 : vector<3x2xf32>
      %cst_99 = arith.constant dense<0.000000e+00> : vector<3xf32>
      %106 = vector.multi_reduction <add>, %105, %cst_99 [1] : vector<3x2xf32> to vector<3xf32>
      %107 = vector.shape_cast %106 : vector<3xf32> to vector<3x1xf32>
      %cst_100 = arith.constant dense<0.000000e+00> : vector<1xf32>
      %108 = vector.multi_reduction <add>, %107, %cst_100 [0] : vector<3x1xf32> to vector<1xf32>
      %109 = vector.shape_cast %108 : vector<1xf32> to vector<1x1xf32>
      %cst_101 = arith.constant 5.000000e-01 : f32
      %110 = vector.broadcast %cst_101 : f32 to vector<1x1xf32>
      %111 = arith.mulf %109, %110 : vector<1x1xf32>
      %cst_102 = arith.constant dense<0.000000e+00> : vector<3xf32>
      %112 = vector.multi_reduction <add>, %92, %cst_102 [1] : vector<3x2xf32> to vector<3xf32>
      %113 = vector.shape_cast %112 : vector<3xf32> to vector<3x1xf32>
      %cst_103 = arith.constant dense<0.000000e+00> : vector<1xf32>
      %114 = vector.multi_reduction <add>, %113, %cst_103 [0] : vector<3x1xf32> to vector<1xf32>
      %115 = vector.shape_cast %114 : vector<1xf32> to vector<1x1xf32>
      %c0_104 = arith.constant 0 : index
      %c0_105 = arith.constant 0 : index
      %116 = vector.load %arg11[%c0_104, %c0_105] : memref<2x128xf32, #tpu.memory_space<vmem>>, vector<2x128xf32>
      %cst_106 = arith.constant dense<0.000000e+00> : vector<2xf32>
      %117 = vector.multi_reduction <add>, %116, %cst_106 [1] : vector<2x128xf32> to vector<2xf32>
      %118 = vector.shape_cast %117 : vector<2xf32> to vector<2x1xf32>
      %cst_107 = arith.constant dense<0.000000e+00> : vector<1xf32>
      %119 = vector.multi_reduction <add>, %118, %cst_107 [0] : vector<2x1xf32> to vector<1xf32>
      %120 = vector.shape_cast %119 : vector<1xf32> to vector<1x1xf32>
      %cst_108 = arith.constant 3.000000e+00 : f32
      %121 = vector.broadcast %cst_108 : f32 to vector<1x1xf32>
      %122 = arith.mulf %121, %115 : vector<1x1xf32>
      %123 = arith.subf %122, %120 : vector<1x1xf32>
      %cst_109 = arith.constant 4.8828125E-4 : f32
      %124 = vector.broadcast %cst_109 : f32 to vector<1x1xf32>
      %125 = arith.mulf %123, %124 : vector<1x1xf32>
      %cst_110 = arith.constant 1.000000e+00 : f32
      %126 = vector.broadcast %cst_110 : f32 to vector<1x1xf32>
      %127 = arith.mulf %126, %125 : vector<1x1xf32>
      %cst_111 = arith.constant 1.000000e-01 : f32
      %128 = vector.broadcast %cst_111 : f32 to vector<1x1xf32>
      %129 = arith.mulf %128, %111 : vector<1x1xf32>
      %130 = arith.addf %127, %129 : vector<1x1xf32>
      %c0_112 = arith.constant 0 : index
      %c0_113 = arith.constant 0 : index
      %131 = vector.load %arg7[%c0_112, %c0_113] : memref<1x1xf32, #tpu.memory_space<vmem>>, vector<1x1xf32>
      tpu.vector_store %arg7[%c0_112, %c0_113], %130 {strides = array<i32>} : memref<1x1xf32, #tpu.memory_space<vmem>>, vector<1x1xf32>,
    } else {
    }
    return
  }
  func.func @transform_0(%arg0: i32) -> (i32, i32, i32) {
    %c0_i32 = arith.constant 0 : i32
    %c0_i32_0 = arith.constant 0 : i32
    %c0_i32_1 = arith.constant 0 : i32
    return %c0_i32, %arg0, %c0_i32_0 : i32, i32, i32
  }
  func.func @transform_1(%arg0: i32) -> (i32, i32, i32) {
    %c0_i32 = arith.constant 0 : i32
    %c0_i32_0 = arith.constant 0 : i32
    %c0_i32_1 = arith.constant 0 : i32
    return %c0_i32, %arg0, %c0_i32_0 : i32, i32, i32
  }
  func.func @transform_2(%arg0: i32) -> (i32, i32, i32) {
    %c0_i32 = arith.constant 0 : i32
    %c0_i32_0 = arith.constant 0 : i32
    %c0_i32_1 = arith.constant 0 : i32
    return %c0_i32, %arg0, %c0_i32_0 : i32, i32, i32
  }
  func.func @transform_3(%arg0: i32) -> (i32, i32, i32) {
    %c0_i32 = arith.constant 0 : i32
    %c0_i32_0 = arith.constant 0 : i32
    %c0_i32_1 = arith.constant 0 : i32
    return %c0_i32, %arg0, %c0_i32_0 : i32, i32, i32
  }
  func.func @transform_4(%arg0: i32) -> (i32, i32, i32) {
    %c0_i32 = arith.constant 0 : i32
    %c0_i32_0 = arith.constant 0 : i32
    %c0_i32_1 = arith.constant 0 : i32
    return %c0_i32, %arg0, %c0_i32_0 : i32, i32, i32
  }
  func.func @transform_5(%arg0: i32) -> (i32, i32, i32) {
    %c0_i32 = arith.constant 0 : i32
    %c0_i32_0 = arith.constant 0 : i32
    %c0_i32_1 = arith.constant 0 : i32
    return %c0_i32, %arg0, %c0_i32_0 : i32, i32, i32
  }
  func.func @transform_6(%arg0: i32) -> (i32, i32) {
    %c0_i32 = arith.constant 0 : i32
    %c0_i32_0 = arith.constant 0 : i32
    %c0_i32_1 = arith.constant 0 : i32
    return %c0_i32, %c0_i32_0 : i32, i32
  }
}

</mosaic_0001>

<bundles_post_ra>
// kernel: tpu_custom_call.1
= control target key start
LH: loop header
LB: loop body
LE: loop exit
PB: predicated region body
PF: predicated region fallthrough
CT: control target
= control target key end

     0   :  { %11 = vsyncpa [#allocation7], 0  ;;  %s998_s0 = inlined_call_operand.hbm [shape: f32[2,8,128], index: 0, kind: input, shape index: {}]   ;;  %s999_s1 = inlined_call_operand.hbm [shape: f32[2,8,128], index: 1, kind: input, shape index: {}]   ;;  %s1000_s2 = inlined_call_operand.hbm [shape: f32[2,8,128], index: 2, kind: input, shape index: {}]   ;;  %s1001_s3 = inlined_call_operand.hbm [shape: f32[2,8,128], index: 3, kind: input, shape index: {}]   ;;  %s1002_s4 = inlined_call_operand.hbm [shape: f32[2,8,128], index: 4, kind: input, shape index: {}]   ;;  %s1003_s5 = inlined_call_operand.hbm [shape: f32[2,8,128], index: 5, kind: input, shape index: {}]   ;;  %s1004_s6 = inlined_call_operand.hbm [shape: f32[1,1], index: 6, kind: output, shape index: {}]  }
   0x1   :  { %12 = vsyncpa [#allocation10], 0 }
   0x2   :  { %13 = vsyncpa [#allocation13], 0 }
   0x3   :  { %14 = vsyncpa [#allocation16], 0 }
   0x4   :  { %15 = vsyncpa [#allocation8], 0  ;;  %s33_s23 = sshll.u32 %s999_s1, 4  ;;  %s762_s24 = smov [#allocation9]   ;;  %s34_s23 = int_to_ptr.hbm [resolvable:$true] %s33_s23 }
   0x5   :  { %s35_s25 = sshll.u32 %s762_s24, 4  ;;  %s59_s28 = sshll.u32 %s1001_s3, 4  ;;  %s36_s25 = int_to_ptr.vmem [resolvable:$true] %s35_s25  ;;  %s60_s28 = int_to_ptr.hbm [resolvable:$true] %s59_s28 }
   0x6   :  { %s763_s29 = smov 128   ;;  %s764_s30 = smov 8  }
   0x7   :  { %41 = dma.hbm_to_vmem [thread:$0]  %s34_s23, 256, %s36_s25, [#allocation10], %s763_s29, %s763_s29, %s764_s30  }
   0x8   :  { %s765_s7 = smov [#allocation12]   ;;  %s20_s1 = sshll.u32 %s998_s0, 4  ;;  %s21_s1 = int_to_ptr.hbm [resolvable:$true] %s20_s1 }
   0x9   :  { %s61_s8 = sshll.u32 %s765_s7, 4  ;;  %s46_s12 = sshll.u32 %s1000_s2, 4  ;;  %s62_s8 = int_to_ptr.vmem [resolvable:$true] %s61_s8  ;;  %s47_s12 = int_to_ptr.hbm [resolvable:$true] %s46_s12 }
   0xa   :  { %67 = dma.hbm_to_vmem [thread:$0]  %s60_s28, 256, %s62_s8, [#allocation13], %s763_s29, %s763_s29, %s764_s30  }
   0xb   :  { %s766_s13 = smov [#allocation6]   ;;  %s767_s15 = smov [#allocation11]  }
   0xc   :  { %s22_s14 = sshll.u32 %s766_s13, 4  ;;  %s48_s0 = sshll.u32 %s767_s15, 4  ;;  %s23_s14 = int_to_ptr.vmem [resolvable:$true] %s22_s14  ;;  %s49_s0 = int_to_ptr.vmem [resolvable:$true] %s48_s0 }
   0xd   :  { %28 = dma.hbm_to_vmem [thread:$0]  %s21_s1, 256, %s23_s14, [#allocation7], %s763_s29, %s763_s29, %s764_s30  }
   0xe   :  { %s72_s18 = sshll.u32 %s1002_s4, 4  ;;  %s85_s20 = sshll.u32 %s1003_s5, 4  ;;  %s73_s18 = int_to_ptr.hbm [resolvable:$true] %s72_s18  ;;  %s86_s20 = int_to_ptr.hbm [resolvable:$true] %s85_s20 }
   0xf   :  { %54 = dma.hbm_to_vmem [thread:$0]  %s47_s12, 256, %s49_s0, [#allocation10], %s763_s29, %s763_s29, %s764_s30  }
  0x10   :  { %s768_s21 = smov [#allocation14]   ;;  %s769_s23 = smov [#allocation15]  }
  0x11   :  { %s74_s22 = sshll.u32 %s768_s21, 4  ;;  %s87_s4 = sshll.u32 %s769_s23, 4  ;;  %s75_s22 = int_to_ptr.vmem [resolvable:$true] %s74_s22  ;;  %s88_s4 = int_to_ptr.vmem [resolvable:$true] %s87_s4 }
  0x12   :  { %80 = dma.hbm_to_vmem [thread:$0]  %s73_s18, 256, %s75_s22, [#allocation13], %s763_s29, %s763_s29, %s764_s30  }
  0x13   :  { %93 = dma.hbm_to_vmem [thread:$0]  %s86_s20, 256, %s88_s4, [#allocation16], %s763_s29, %s763_s29, %s764_s30  }
  0x14   :  { %752 = dma.done.wait [#allocation7], 256  }
  0x15   :  { %753 = vsyncadd [#allocation7], 4294967040 }
  0x16   :  { %754 = dma.done.wait [#allocation10], 512  }
  0x17   :  { %755 = vsyncadd [#allocation10], 4294966784 }
  0x18   :  { %756 = dma.done.wait [#allocation13], 512  }
  0x19   :  { %757 = vsyncadd [#allocation13], 4294966784 }
  0x1a   :  { %758 = dma.done.wait [#allocation16], 256  }
  0x1b   :  { %759 = vsyncadd [#allocation16], 4294967040  ;;  %v770_v0 = vmov 0.0   ;;  %v843_v1 = vld [vmem:[#allocation14] sm:$0xff]  ;;  %v845_v2 = vld [vmem:[#allocation14 + $0x8] sm:$0xff]  ;;  %vm153_vm0 = vcmask 1041409  }
  0x1c   :  { %126 = vst [vmem:[#allocation3 + $0x2] sm:$0x3] %v770_v0  ;;  %v847_v3 = vld [vmem:[#allocation11] sm:$0xff]  ;;  %v228_v4 = vmul.f32 %v843_v1, %v843_v1  ;;  %v229_v5 = vmul.f32 %v845_v2, %v845_v2  ;;  %v853_v6 = vld [vmem:[#allocation11 + $0x8] sm:$0xff]  ;;  %v865_v12 = vld [vmem:[#allocation15] sm:$0xff]  ;;  %vm371_vm1 = vcmask 1041408  }
  0x1d   :  { %122 = vst [vmem:[#allocation2] sm:$0x3] %v770_v0  ;;  %v278_v7 = vmul.f32 %v847_v3, %v847_v3  ;;  %v857_v8 = vld [vmem:[#allocation6] sm:$0xff]  ;;  %v279_v9 = vmul.f32 %v853_v6, %v853_v6  ;;  %v861_v10 = vld [vmem:[#allocation6 + $0x8] sm:$0xff]  ;;  %v869_v17 = vld [vmem:[#allocation15 + $0x8] sm:$0xff]  ;;  %v300_v20 = vmul.f32 %v865_v12, %v865_v12  ;;  %vm489_vm2 = vcmask 1042434  }
  0x1e   :  { %123 = vst [vmem:[#allocation2 + $0x2] sm:$0x3] %v770_v0  ;;  %v137_v11 = vmul.f32 %v857_v8, %v857_v8  ;;  %v230_v13 = vrot.slane %v228_v4, 4  ;;  %v236_v14 = vrot.slane %v229_v5, 4  ;;  %v138_v16 = vmul.f32 %v861_v10, %v861_v10  ;;  %v134_v54 = vld [vmem:[#allocation12] sm:$0xff]  ;;  %v135_v55 = vld [vmem:[#allocation12 + $0x8] sm:$0xff] }
  0x1f   :  { %124 = vst [vmem:[#allocation2 + $0x4] sm:$0x3] %v770_v0  ;;  %v280_v15 = vrot.slane %v278_v7, 4  ;;  %v286_v18 = vrot.slane %v279_v9, 4  ;;  %v301_v21 = vmul.f32 %v869_v17, %v869_v17  ;;  %v302_v28 = vrot.slane %v300_v20, 4  ;;  %s771_s5 = smov [#allocation17]  }
  0x20   :  { %125 = vst [vmem:[#allocation3] sm:$0x3] %v770_v0  ;;  %v139_v19 = vrot.slane %v137_v11, 4  ;;  %v231_v22 = vadd.f32 %v230_v13, %v228_v4  ;;  %v237_v23 = vadd.f32 %v236_v14, %v229_v5  ;;  %v145_v25 = vrot.slane %v138_v16, 4  ;;  %v876_v14 = vld [vmem:[#allocation9] sm:$0xff]  ;;  %s547_s24 = sshll.u32 %s771_s5, 4  ;;  %s548_s24 = int_to_ptr.vmem [resolvable:$true] %s547_s24 }
  0x21   :  { %127 = vst [vmem:[#allocation3 + $0x4] sm:$0x3] %v770_v0  ;;  %v281_v24 = vadd.f32 %v280_v15, %v278_v7  ;;  %v287_v26 = vadd.f32 %v286_v18, %v279_v9  ;;  %v308_v29 = vrot.slane %v301_v21, 4  ;;  %v303_v36 = vadd.f32 %v302_v28, %v300_v20  ;;  %v878_v15 = vld [vmem:[#allocation9 + $0x8] sm:$0xff]  ;;  %s549_s27 = sshll.u32 %s1004_s6, 4  ;;  %s550_s27 = int_to_ptr.hbm [resolvable:$true] %s549_s27 }
  0x22   :  { %128 = vst [vmem:[#allocation4] sm:$0x3] %v770_v0  ;;  %v140_v27 = vadd.f32 %v139_v19, %v137_v11  ;;  %v232_v30 = vrot.slane %v231_v22, 2  ;;  %v238_v31 = vrot.slane %v237_v23, 2  ;;  %v146_v33 = vadd.f32 %v145_v25, %v138_v16 }
  0x23   :  { %129 = vst [vmem:[#allocation4 + $0x2] sm:$0x3] %v770_v0  ;;  %v282_v32 = vrot.slane %v281_v24, 2  ;;  %v288_v34 = vrot.slane %v287_v26, 2  ;;  %v309_v37 = vadd.f32 %v308_v29, %v301_v21  ;;  %v304_v44 = vrot.slane %v303_v36, 2 }
  0x24   :  { %130 = vst [vmem:[#allocation4 + $0x4] sm:$0x3] %v770_v0  ;;  %v141_v35 = vrot.slane %v140_v27, 2  ;;  %v233_v38 = vadd.f32 %v232_v30, %v231_v22  ;;  %v239_v39 = vadd.f32 %v238_v31, %v237_v23  ;;  %v147_v41 = vrot.slane %v146_v33, 2  ;;  %v227_v56 = vld [vmem:[#allocation3 + $0x2] sm:$0x3] }
  0x25   :  { %131 = vst [vmem:[#allocation5] sm:$0x3] %v770_v0  ;;  %v283_v40 = vadd.f32 %v282_v32, %v281_v24  ;;  %v289_v42 = vadd.f32 %v288_v34, %v287_v26  ;;  %v310_v45 = vrot.slane %v309_v37, 2  ;;  %v305_v52 = vadd.f32 %v304_v44, %v303_v36  ;;  %v136_v7 = vld [vmem:[#allocation2] sm:$0x3] }
  0x26   :  { %v142_v43 = vadd.f32 %v141_v35, %v140_v27  ;;  %v234_v46 = vrot.slane %v233_v38, 1  ;;  %v240_v47 = vrot.slane %v239_v39, 1  ;;  %v148_v49 = vadd.f32 %v147_v41, %v146_v33  ;;  %v277_v61 = vld [vmem:[#allocation2 + $0x4] sm:$0x3] }
  0x27   :  { %v284_v48 = vrot.slane %v283_v40, 1  ;;  %v290_v50 = vrot.slane %v289_v42, 1  ;;  %v311_v53 = vadd.f32 %v310_v45, %v309_v37  ;;  %v306_v0 = vrot.slane %v305_v52, 1 }
  0x28   :  { %v143_v51 = vrot.slane %v142_v43, 1  ;;  %v235_v57 = vadd.f32 %v234_v46, %v233_v38  ;;  %v241_v58 = vadd.f32 %v240_v47, %v239_v39  ;;  %v149_v60 = vrot.slane %v148_v49, 1  ;;  %v299_v19 = vld [vmem:[#allocation3 + $0x4] sm:$0x3] }
  0x29   :  { %v285_v59 = vadd.f32 %v284_v48, %v283_v40  ;;  %v291_v62 = vadd.f32 %v290_v50, %v289_v42  ;;  %v312_v4 = vrot.slane %v311_v53, 1  ;;  %v159_v11 = vmul.f32 %v134_v54, %v134_v54 }
  0x2a   :  { %v144_v63 = vadd.f32 %v143_v51, %v142_v43  ;;  %v244_v5 = vsel %vm153_vm0, %v241_v58, %v235_v57  ;;  %v150_v9 = vadd.f32 %v149_v60, %v148_v49  ;;  %v160_v13 = vmul.f32 %v135_v55, %v135_v55 }
  0x2b   :  { %v246_v16 = vadd.f32 %v244_v5, %v227_v56  ;;  %v294_v18 = vsel %vm153_vm0, %v291_v62, %v285_v59  ;;  %v307_v20 = vadd.f32 %v306_v0, %v305_v52  ;;  %v313_v21 = vadd.f32 %v312_v4, %v311_v53  ;;  %v158_v0 = vld [vmem:[#allocation3] sm:$0x3] }
  0x2c   :  { %v296_v22 = vadd.f32 %v294_v18, %v277_v61  ;;  %v154_v23 = vsel %vm153_vm0, %v150_v9, %v144_v63  ;;  %v161_v24 = vrot.slane %v159_v11, 4  ;;  %v167_v25 = vrot.slane %v160_v13, 4 }
  0x2d   :  { %247 = vst [vmem:[#allocation3 + $0x2] sm:$0x3] %v246_v16  ;;  %v156_v26 = vadd.f32 %v154_v23, %v136_v7  ;;  %v316_v27 = vsel %vm153_vm0, %v313_v21, %v307_v20  ;;  %v206_v28 = vmul.f32 %v876_v14, %v876_v14  ;;  %v207_v29 = vmul.f32 %v878_v15, %v878_v15  ;;  %v205_v23 = vld [vmem:[#allocation2 + $0x2] sm:$0x3] }
  0x2e   :  { %297 = vst [vmem:[#allocation2 + $0x4] sm:$0x3] %v296_v22  ;;  %v318_v30 = vadd.f32 %v316_v27, %v299_v19  ;;  %v162_v31 = vadd.f32 %v161_v24, %v159_v11  ;;  %v168_v32 = vadd.f32 %v167_v25, %v160_v13  ;;  %v322_v33 = vmul.f32 %v865_v12, %v847_v3 }
  0x2f   :  { %157 = vst [vmem:[#allocation2] sm:$0x3] %v156_v26  ;;  %v208_v34 = vrot.slane %v206_v28, 4  ;;  %v214_v35 = vrot.slane %v207_v29, 4  ;;  %v323_v36 = vmul.f32 %v869_v17, %v853_v6  ;;  %v180_v37 = vmul.f32 %v134_v54, %v857_v8 }
  0x30   :  { %319 = vst [vmem:[#allocation3 + $0x4] sm:$0x3] %v318_v30  ;;  %v163_v38 = vrot.slane %v162_v31, 2  ;;  %v169_v39 = vrot.slane %v168_v32, 2  ;;  %v324_v40 = vrot.slane %v322_v33, 4  ;;  %v181_v41 = vmul.f32 %v135_v55, %v861_v10 }
  0x31   :  { %v209_v42 = vadd.f32 %v208_v34, %v206_v28  ;;  %v215_v43 = vadd.f32 %v214_v35, %v207_v29  ;;  %v330_v44 = vrot.slane %v323_v36, 4  ;;  %v182_v45 = vrot.slane %v180_v37, 4 }
  0x32   :  { %v164_v46 = vadd.f32 %v163_v38, %v162_v31  ;;  %v170_v12 = vadd.f32 %v169_v39, %v168_v32  ;;  %v325_v47 = vadd.f32 %v324_v40, %v322_v33  ;;  %v188_v48 = vrot.slane %v181_v41, 4  ;;  %v321_v33 = vld [vmem:[#allocation4 + $0x4] sm:$0x3] }
  0x33   :  { %v210_v49 = vrot.slane %v209_v42, 2  ;;  %v216_v50 = vrot.slane %v215_v43, 2  ;;  %v331_v51 = vadd.f32 %v330_v44, %v323_v36  ;;  %v183_v17 = vadd.f32 %v182_v45, %v180_v37 }
  0x34   :  { %v382_v52 = vld [vmem:[#allocation3 + $0x2] sm:$0x3]  ;;  %v165_v53 = vrot.slane %v164_v46, 1  ;;  %v171_v54 = vrot.slane %v170_v12, 1  ;;  %v326_v56 = vrot.slane %v325_v47, 2  ;;  %v189_v57 = vadd.f32 %v188_v48, %v181_v41 }
  0x35   :  { %v387_v58 = vsel %vm371_vm1, %v382_v52, 0.0  ;;  %v370_v55 = vld [vmem:[#allocation2 + $0x4] sm:$0x3]  ;;  %v211_v59 = vadd.f32 %v210_v49, %v209_v42  ;;  %v217_v60 = vadd.f32 %v216_v50, %v215_v43  ;;  %v332_v61 = vrot.slane %v331_v51, 2 }
  0x36   :  { %388 = vadd.xlane.f32.xlu2 %v387_v58  ;;  %v378_v62 = vsel %vm371_vm1, %v370_v55, 0.0  ;;  %v368_v63 = vld [vmem:[#allocation2] sm:$0x3]  ;;  %v166_v4 = vadd.f32 %v165_v53, %v164_v46  ;;  %v172_v5 = vadd.f32 %v171_v54, %v170_v12  ;;  %v327_v7 = vadd.f32 %v326_v56, %v325_v47  ;;  %v179_v46 = vld [vmem:[#allocation4] sm:$0x3] }
  0x37   :  { %379 = vadd.xlane.f32.xlu1 %v378_v62  ;;  %v372_v9 = vsel %vm371_vm1, %v368_v63, 0.0  ;;  %v212_v11 = vrot.slane %v211_v59, 1  ;;  %v218_v13 = vrot.slane %v217_v60, 1  ;;  %v333_v16 = vadd.f32 %v332_v61, %v331_v51  ;;  %v383_v18 = vld [vmem:[#allocation3 + $0x4] sm:$0x3] }
  0x38   :  { %373 = vadd.xlane.f32.xlu0 %v372_v9  ;;  %v175_v19 = vsel %vm153_vm0, %v172_v5, %v166_v4  ;;  %v328_v20 = vrot.slane %v327_v7, 1  ;;  %v184_v21 = vrot.slane %v183_v17, 2  ;;  %v190_v29 = vrot.slane %v189_v57, 2 }
  0x39   :  { %v177_v22 = vadd.f32 %v175_v19, %v158_v0  ;;  %v213_v24 = vadd.f32 %v212_v11, %v211_v59  ;;  %v219_v25 = vadd.f32 %v218_v13, %v217_v60  ;;  %v334_v26 = vrot.slane %v333_v16, 1  ;;  %v249_v59 = vld [vmem:[#allocation4 + $0x2] sm:$0x3] }
  0x3a   :  { %v329_v27 = vadd.f32 %v328_v20, %v327_v7  ;;  %v185_v28 = vadd.f32 %v184_v21, %v183_v17  ;;  %v250_v30 = vmul.f32 %v843_v1, %v876_v14  ;;  %v390_v31 = vsel %vm371_vm1, %v383_v18, 0.0 }
  0x3b   :  { %178 = vst [vmem:[#allocation3] sm:$0x3] %v177_v22  ;;  %v222_v32 = vsel %vm153_vm0, %v219_v25, %v213_v24  ;;  %v335_v34 = vadd.f32 %v334_v26, %v333_v16  ;;  %v251_v35 = vmul.f32 %v845_v2, %v878_v15  ;;  %v191_v38 = vadd.f32 %v190_v29, %v189_v57 }
  0x3c   :  { %v224_v36 = vadd.f32 %v222_v32, %v205_v23  ;;  %v186_v37 = vrot.slane %v185_v28, 1  ;;  %v252_v39 = vrot.slane %v250_v30, 4  ;;  %v270_v9 = vadd.f32 %v876_v14, %v857_v8 }
  0x3d   :  { %v338_v40 = vsel %vm153_vm0, %v335_v34, %v329_v27  ;;  %v258_v41 = vrot.slane %v251_v35, 4  ;;  %v192_v43 = vrot.slane %v191_v38, 1  ;;  %v271_v11 = vadd.f32 %v878_v15, %v861_v10 }
  0x3e   :  { %391 = vadd.xlane.f32.xlu2 %v390_v31  ;;  %225 = vst [vmem:[#allocation2 + $0x2] sm:$0x3] %v224_v36  ;;  %v340_v1 = vadd.f32 %v338_v40, %v321_v33  ;;  %v187_v42 = vadd.f32 %v186_v37, %v185_v28  ;;  %v253_v44 = vadd.f32 %v252_v39, %v250_v30  ;;  %v344_v30 = vld [vmem:[#allocation5] sm:$0x3]  ;;  %v483_v40 = vlaneseq }
  0x3f   :  { %v259_v45 = vadd.f32 %v258_v41, %v251_v35  ;;  %v193_v12 = vadd.f32 %v192_v43, %v191_v38  ;;  %v342_v13 = vadd.f32 %v847_v3, %v270_v9  ;;  %v343_v16 = vadd.f32 %v853_v6, %v271_v11 }
  0x40   :  { %341 = vst [vmem:[#allocation4 + $0x4] sm:$0x3] %v340_v1  ;;  %v254_v47 = vrot.slane %v253_v44, 2  ;;  %v935_v43 = vand.u32 127, %v483_v40  ;;  %vm492_vm3 = vcmask 10240  }
  0x41   :  { %v260_v48 = vrot.slane %v259_v45, 2  ;;  %v196_v49 = vsel %vm153_vm0, %v193_v12, %v187_v42  ;;  %v345_v18 = vmul.f32 %v342_v13, %v342_v13  ;;  %v346_v19 = vmul.f32 %v343_v16, %v343_v16 }
  0x42   :  { %v381_v2 = vld [vmem:[#allocation3] sm:$0x3]  ;;  %v255_v50 = vadd.f32 %v254_v47, %v253_v44  ;;  %v198_v17 = vadd.f32 %v196_v49, %v179_v46 }
  0x43   :  { %v384_v51 = vsel %vm371_vm1, %v381_v2, 0.0  ;;  %v261_v52 = vadd.f32 %v260_v48, %v259_v45  ;;  %v347_v20 = vrot.slane %v345_v18, 4  ;;  %v353_v21 = vrot.slane %v346_v19, 4 }
  0x44   :  { %385 = vadd.xlane.f32.xlu1 %v384_v51  ;;  %v256_v53 = vrot.slane %v255_v50, 1  ;;  %199 = vst [vmem:[#allocation4] sm:$0x3] %v198_v17 }
  0x45   :  { %v369_v54 = vld [vmem:[#allocation2 + $0x2] sm:$0x3]  ;;  %v262_v56 = vrot.slane %v261_v52, 1  ;;  %v348_v22 = vadd.f32 %v347_v20, %v345_v18  ;;  %v354_v23 = vadd.f32 %v353_v21, %v346_v19 }
  0x46   :  { %v375_v57 = vsel %vm371_vm1, %v369_v54, 0.0  ;;  %v257_v58 = vadd.f32 %v256_v53, %v255_v50 }
  0x47   :  { %376 = vadd.xlane.f32.xlu0 %v375_v57  ;;  %v395_v55 = vld [vmem:[#allocation4 + $0x4] sm:$0x3]  ;;  %v263_v60 = vadd.f32 %v262_v56, %v261_v52  ;;  %v349_v24 = vrot.slane %v348_v22, 2  ;;  %v355_v25 = vrot.slane %v354_v23, 2 }
  0x48   :  { %v402_v61 = vsel %vm371_vm1, %v395_v55, 0.0 }
  0x49   :  { %403 = vadd.xlane.f32.xlu2 %v402_v61  ;;  %v266_v62 = vsel %vm153_vm0, %v263_v60, %v257_v58  ;;  %v350_v26 = vadd.f32 %v349_v24, %v348_v22  ;;  %v356_v27 = vadd.f32 %v355_v25, %v354_v23 }
  0x4a   :  { %v268_v63 = vadd.f32 %v266_v62, %v249_v59 }
  0x4b   :  { %v393_v0 = vld [vmem:[#allocation4] sm:$0x3]  ;;  %v351_v28 = vrot.slane %v350_v26, 1  ;;  %v357_v29 = vrot.slane %v356_v27, 1 }
  0x4c   :  { %269 = vst [vmem:[#allocation4 + $0x2] sm:$0x3] %v268_v63  ;;  %v396_v4 = vsel %vm371_vm1, %v393_v0, 0.0 }
  0x4d   :  { %v352_v8 = vadd.f32 %v351_v28, %v350_v26  ;;  %v358_v14 = vadd.f32 %v357_v29, %v356_v27 }
  0x4f   :  { %397 = vadd.xlane.f32.xlu0 %v396_v4  ;;  %v361_v10 = vsel %vm153_vm0, %v358_v14, %v352_v8 }
  0x50   :  { %v363_v3 = vadd.f32 %v361_v10, %v344_v30 }
  0x52   :  { %364 = vst [vmem:[#allocation5] sm:$0x3] %v363_v3 }
  0x53   :  { %v394_v5 = vld [vmem:[#allocation4 + $0x2] sm:$0x3] }
  0x54   :  { %v399_v7 = vsel %vm371_vm1, %v394_v5, 0.0 }
  0x55   :  { %400 = vadd.xlane.f32.xlu1 %v399_v7 }
  0x59   :  { %v524_v6 = vld [vmem:[#allocation5] sm:$0x3] }
  0x5a   :  { %v525_v15 = vsel %vm371_vm1, %v524_v6, 0.0 }
  0x5b   :  { %526 = vadd.xlane.f32.xlu2 %v525_v15 }
  0xa9   :  { %v389_v31 = vpop.xlane.xlu2 %388 }
  0xaa   :  { %v380_v32 = vpop.xlane.xlu1 %379  ;;  %v922_v36 = vmax.f32 %v389_v31, 1e-24 }
  0xab   :  { %v919_v33 = vmax.f32 %v380_v32, 1e-24  ;;  %v374_v34 = vpop.xlane.xlu0 %373  ;;  %v510_v53 = vperm.slane %v380_v32, %v935_v43 }
  0xac   :  { %v405_v35 = vmax.f32 %v374_v34, 1e-24  ;;  %v508_v49 = vperm.slane %v374_v34, %v935_v43 }
  0xad   :  { %572 = vrsqrt.f32 %v919_v33  ;;  %vm434_vm8 = vweird.f32 %v919_v33 }
  0xae   :  { %574 = vrsqrt.f32 %v405_v35  ;;  %vm414_vm7 = vweird.f32 %v405_v35 }
  0xaf   :  { %576 = vrsqrt.f32 %v922_v36 }
  0xb1   :  { %v392_v37 = vpop.xlane.xlu2 %391 }
  0xb2   :  { %v924_v38 = vmax.f32 %v392_v37, 1e-24 }
  0xb3   :  { %v926_v39 = vpop.eup %572 }
  0xb4   :  { %v929_v41 = vpop.eup %574  ;;  %578 = vrsqrt.f32 %v924_v38  ;;  %v429_v1 = vmul.f32 %v926_v39, %v919_v33  ;;  %vm435_vm5 = vweird.f32 %v926_v39  ;;  %vm467_vm11 = vweird.f32 %v924_v38 }
  0xb5   :  { %v409_v42 = vmul.f32 %v929_v41, %v405_v35  ;;  %v938_v12 = vpop.eup %576  ;;  %vm415_vm4 = vweird.f32 %v929_v41  ;;  %vm967_vm12 = vmor %vm434_vm8, %vm435_vm5  ;;  %vm457_vm8 = vweird.f32 %v922_v36 }
  0xb6   :  { %v430_v47 = vmul.f32 %v926_v39, %v429_v1  ;;  %v452_v52 = vmul.f32 %v938_v12, %v922_v36  ;;  %vm962_vm9 = vmor %vm414_vm7, %vm415_vm4  ;;  %vm458_vm5 = vweird.f32 %v938_v12 }
  0xb7   :  { %v386_v44 = vpop.xlane.xlu1 %385  ;;  %v410_v45 = vmul.f32 %v929_v41, %v409_v42 }
  0xb8   :  { %v438_v46 = vmax.f32 %v386_v44, 1e-24  ;;  %v431_v58 = vmul.f32 0.5, %v430_v47  ;;  %v453_v62 = vmul.f32 %v938_v12, %v452_v52 }
  0xb9   :  { %v411_v54 = vmul.f32 0.5, %v410_v45 }
  0xba   :  { %v941_v48 = vpop.eup %578  ;;  %580 = vrsqrt.f32 %v438_v46  ;;  %v377_v2 = vpop.xlane.xlu0 %376  ;;  %v432_v4 = vsub.f32 1.5, %v431_v58  ;;  %v454_v11 = vmul.f32 0.5, %v453_v62  ;;  %vm447_vm13 = vweird.f32 %v438_v46 }
  0xbb   :  { %v462_v50 = vmul.f32 %v941_v48, %v924_v38  ;;  %v406_v51 = vmax.f32 %v377_v2, 1e-24  ;;  %v509_v17 = vperm.slane %v377_v2, %v935_v43  ;;  %v412_v63 = vsub.f32 1.5, %v411_v54 }
  0xbc   :  { %v433_v19 = vmul.f32 %v926_v39, %v432_v4  ;;  %vm468_vm6 = vweird.f32 %v941_v48  ;;  %v455_v24 = vsub.f32 1.5, %v454_v11  ;;  %v404_v8 = vpop.xlane.xlu2 %403 }
  0xbd   :  { %v463_v56 = vmul.f32 %v941_v48, %v462_v50  ;;  %582 = vrsqrt.f32 %v406_v51  ;;  %v511_v57 = vsel %vm153_vm0, %v509_v17, %v508_v49  ;;  %v413_v16 = vmul.f32 %v929_v41, %v412_v63  ;;  %vm974_vm14 = vmor %vm467_vm11, %vm468_vm6 }
  0xbe   :  { %v512_v55 = vsel %vm489_vm2, %v510_v53, %v511_v57  ;;  %v437_v14 = vsel %vm967_vm12, %v926_v39, %v433_v19  ;;  %v456_v32 = vmul.f32 %v938_v12, %v455_v24  ;;  %vm424_vm6 = vweird.f32 %v406_v51 }
  0xbf   :  { %v464_v59 = vmul.f32 0.5, %v463_v56  ;;  %v514_v60 = vsel %vm492_vm3, %v512_v55, 0.0  ;;  %v417_v26 = vsel %vm962_vm9, %v929_v41, %v413_v16  ;;  %v473_v31 = vmul.f32 %v437_v14, %v404_v8  ;;  %vm459_vm9 = vmor %vm457_vm8, %vm458_vm5 }
  0xc0   :  { %v581_v61 = vpop.eup %580  ;;  %515 = vadd.xlane.f32.xlu0 %v514_v60  ;;  %v460_v40 = vsel %vm459_vm9, %v938_v12, %v456_v32 }
  0xc1   :  { %v442_v0 = vmul.f32 %v581_v61, %v438_v46  ;;  %v465_v7 = vsub.f32 1.5, %v464_v59  ;;  %vm448_vm10 = vweird.f32 %v581_v61 }
  0xc2   :  { %v398_v27 = vpop.xlane.xlu0 %397  ;;  %vm449_vm15 = vmor %vm447_vm13, %vm448_vm10  ;;  %vm496_vm10 = vcmask 1042432  }
  0xc3   :  { %v583_v5 = vpop.eup %582  ;;  %v443_v9 = vmul.f32 %v581_v61, %v442_v0  ;;  %v466_v22 = vmul.f32 %v941_v48, %v465_v7  ;;  %v471_v15 = vmul.f32 %v417_v26, %v398_v27 }
  0xc4   :  { %v419_v13 = vmul.f32 %v583_v5, %v406_v51  ;;  %vm425_vm4 = vweird.f32 %v583_v5 }
  0xc5   :  { %v444_v18 = vmul.f32 0.5, %v443_v9  ;;  %v470_v3 = vsel %vm974_vm14, %v941_v48, %v466_v22  ;;  %vm426_vm7 = vmor %vm424_vm6, %vm425_vm4 }
  0xc6   :  { %v420_v20 = vmul.f32 %v583_v5, %v419_v13  ;;  %v476_v37 = vmul.f32 %v473_v31, %v470_v3 }
  0xc7   :  { %v445_v21 = vsub.f32 1.5, %v444_v18 }
  0xc8   :  { %v421_v28 = vmul.f32 0.5, %v420_v20  ;;  %v401_v33 = vpop.xlane.xlu1 %400  ;;  %v479_v42 = vmul.f32 %v476_v37, %v476_v37 }
  0xc9   :  { %v446_v30 = vmul.f32 %v581_v61, %v445_v21 }
  0xca   :  { %v422_v10 = vsub.f32 1.5, %v421_v28  ;;  %v487_v47 = vperm.slane %v479_v42, %v935_v43 }
  0xcb   :  { %v450_v6 = vsel %vm449_vm15, %v581_v61, %v446_v30 }
  0xcc   :  { %v423_v34 = vmul.f32 %v583_v5, %v422_v10  ;;  %v474_v35 = vmul.f32 %v471_v15, %v450_v6 }
  0xce   :  { %v427_v38 = vsel %vm426_vm7, %v583_v5, %v423_v34  ;;  %v477_v41 = vmul.f32 %v474_v35, %v474_v35  ;;  %v527_v50 = vpop.xlane.xlu2 %526 }
  0xcf   :  { %v472_v39 = vmul.f32 %v427_v38, %v401_v33  ;;  %v528_v17 = vsel %vm371_vm1, %v527_v50, 0.0 }
  0xd0   :  { %v485_v45 = vperm.slane %v477_v41, %v935_v43  ;;  %v529_v53 = vrot.slane %v528_v17, 4 }
  0xd1   :  { %v475_v1 = vmul.f32 %v472_v39, %v460_v40 }
  0xd2   :  { %v530_v56 = vadd.f32 %v529_v53, %v528_v17 }
  0xd3   :  { %v478_v44 = vmul.f32 %v475_v1, %v475_v1 }
  0xd5   :  { %v486_v46 = vperm.slane %v478_v44, %v935_v43  ;;  %v531_v43 = vrot.slane %v530_v56, 2 }
  0xd7   :  { %v488_v48 = vsel %vm153_vm0, %v486_v46, %v485_v45  ;;  %v532_v55 = vadd.f32 %v531_v43, %v530_v56  ;;  %vm540_vm0 = vcmask 0  }
  0xd8   :  { %v490_v36 = vsel %vm489_vm2, %v487_v47, %v488_v48 }
  0xd9   :  { %v493_v2 = vsel %vm492_vm3, %v490_v36, 0.0  ;;  %v533_v63 = vrot.slane %v532_v55, 1 }
  0xda   :  { %494 = vadd.xlane.f32.xlu1 %v493_v2 }
  0xdb   :  { %v534_v7 = vadd.f32 %v533_v63, %v532_v55 }
 0x133   :  { %v516_v49 = vpop.xlane.xlu0 %515 }
 0x134   :  { %v517_v12 = vsel %vm496_vm10, %v516_v49, 0.0 }
 0x135   :  { %v518_v51 = vrot.slane %v517_v12, 4 }
 0x137   :  { %v519_v52 = vadd.f32 %v518_v51, %v517_v12 }
 0x139   :  { %v520_v54 = vrot.slane %v519_v52, 2 }
 0x13b   :  { %v521_v57 = vadd.f32 %v520_v54, %v519_v52 }
 0x13d   :  { %v522_v58 = vrot.slane %v521_v57, 1 }
 0x13f   :  { %v523_v62 = vadd.f32 %v522_v58, %v521_v57 }
 0x141   :  { %v535_v5 = vmul.f32 3.0, %v523_v62 }
 0x143   :  { %v536_v13 = vsub.f32 %v535_v5, %v534_v7 }
 0x145   :  { %v537_v19 = vmul.f32 0.00048828125, %v536_v13 }
 0x14d   :  { %v495_v59 = vpop.xlane.xlu1 %494 }
 0x14e   :  { %v497_v60 = vsel %vm496_vm10, %v495_v59, 0.0 }
 0x14f   :  { %v498_v61 = vrot.slane %v497_v60, 4 }
 0x151   :  { %v499_v0 = vadd.f32 %v498_v61, %v497_v60 }
 0x153   :  { %v500_v4 = vrot.slane %v499_v0, 2 }
 0x155   :  { %v501_v9 = vadd.f32 %v500_v4, %v499_v0 }
 0x157   :  { %v502_v11 = vrot.slane %v501_v9, 1 }
 0x159   :  { %v503_v16 = vadd.f32 %v502_v11, %v501_v9 }
 0x15b   :  { %v504_v18 = vmul.f32 0.5, %v503_v16 }
 0x15d   :  { %v538_v20 = vmul.f32 0.1, %v504_v18 }
 0x15f   :  { %v539_v21 = vadd.f32 %v538_v20, %v537_v19 }
 0x161   :  { %541 = vst.msk [vmem:[#allocation17] sm:$0x1] %vm540_vm0, %v539_v21 }
 0x162   :  { %552 = dma.vmem_to_hbm [thread:$0]  %s548_s24, 16, %s550_s27, [#allocation8]  }
 0x163   :  { %760 = dma.done.wait [#allocation8], 16  }
 0x164   :  { %761 = vsyncadd [#allocation8], 4294967280 }
 0x165   :  { %557 = vsyncpa [#allocation7], 1 }
 0x166   :  { %558 = vsyncpa [#allocation10], 1 }
 0x167   :  { %559 = vsyncpa [#allocation13], 1 }
 0x168   :  { %560 = vsyncpa [#allocation16], 1 }
 0x169   :  { %561 = vsyncpa [#allocation8], 1 }

</bundles_post_ra>
